<compile_context>
chip_gen: v7x
topology: tpu7x:2x2x1
jax: 0.10.0
libtpu: 0.0.40
codegen_flags: <defaults>
</compile_context>

<pallas_src>
import jax
import jax.numpy as jnp
from jax.experimental import pallas as pl
from jax.experimental.pallas import tpu as pltpu

LANE = 128
SUBLANE = 8
NUM_LAYERS = 6  # 5 hidden Linear+ReLU layers + 1 output Linear


def _round_up(n, m):
    return (n + m - 1) // m * m


def _cdiv(a, b):
    return (a + b - 1) // b


def _dqn_kernel(x_ref, w0_ref, w_ref, b_ref, o_ref):
    """One batch tile of the 6-layer MLP, fully resident in VMEM.

    x_ref : (TB, state_dim)      f32   natural (un-lane-padded) input tile
    w0_ref: (state_dim, PW)      bf16  layer-0 weight (resident across grid)
    w_ref : (5, PW, PW)          bf16  layers 1..5 weight stack (resident)
    b_ref : (6, 1, PW)           f32   bias stack (resident)
    o_ref : (TB, PW)             bf16  padded output tile (real actions = prefix slice)
    """
    # Layer 0: K = state_dim (small K -> fewer MXU pushes), N = PW.
    y = jnp.dot(x_ref[...].astype(jnp.bfloat16), w0_ref[...],
                preferred_element_type=jnp.float32) + b_ref[0]
    h = jnp.maximum(y, 0.0).astype(jnp.bfloat16)          # bf16 inter-layer activations

    # Layers 1..4: Linear + ReLU (statically unrolled).
    for i in range(NUM_LAYERS - 2):
        y = jnp.dot(h, w_ref[i], preferred_element_type=jnp.float32) + b_ref[i + 1]
        h = jnp.maximum(y, 0.0).astype(jnp.bfloat16)

    # Layer 5: Linear (no ReLU), lane-dense bf16 store.
    y = jnp.dot(h, w_ref[NUM_LAYERS - 2],
                preferred_element_type=jnp.float32) + b_ref[NUM_LAYERS - 1]
    o_ref[...] = y.astype(o_ref.dtype)


def pack_dqn_params(params):
    """Pack 6 (W, b) pairs (W: (in, out) f32, b: (1, out) f32) into:
         w0    : (state_dim, PW)  bf16   layer-0 weight (rows NOT lane-padded)
         w_rest: (5, PW, PW)      bf16   layers 1..5, zero lane-padded
         b_all : (6, 1, PW)       f32    zero lane-padded biases
       Zero padding leaves the math unchanged (padded lanes stay exactly 0 through ReLU)."""
    state_dim = params[0][0].shape[0]
    out_dims = [w.shape[1] for w, _ in params]
    pw = _round_up(max(out_dims), LANE)

    w0 = jnp.zeros((state_dim, pw), jnp.float32).at[:, :out_dims[0]].set(params[0][0])
    w_rest = jnp.zeros((NUM_LAYERS - 1, pw, pw), jnp.float32)
    b_all = jnp.zeros((NUM_LAYERS, 1, pw), jnp.float32)
    b_all = b_all.at[0, 0, :out_dims[0]].set(params[0][1].reshape(-1))
    for i in range(1, NUM_LAYERS):
        w, b = params[i]
        fin, fout = w.shape
        w_rest = w_rest.at[i - 1, :fin, :fout].set(w)
        b_all = b_all.at[i, 0, :fout].set(b.reshape(-1))
    return w0.astype(jnp.bfloat16), w_rest.astype(jnp.bfloat16), b_all, pw


def dqn_forward(x, w0, w_rest, b_all, nb_actions, *,
                max_batch_tile=2048, min_split_rows=1024):
    """x: (B, state_dim) f32. Returns (B, nb_actions) f32."""
    B, state_dim = x.shape
    pw = w_rest.shape[-1]

    # --- batch tiling -------------------------------------------------------
    # Big tiles amortize per-step overhead (v5e/v6e); >=2 tiles when B is large
    # enough so v7x's two TensorCores both work.  Pad only to a sublane multiple
    # of the chosen tile (no full-tile rounding -> minimal junk rows).
    n_tiles = max(1, _cdiv(B, max_batch_tile))
    if n_tiles < 2 and B >= min_split_rows:
        n_tiles = 2
    tb = _round_up(_cdiv(B, n_tiles), SUBLANE)
    b_pad = n_tiles * tb

    x_in = x.astype(jnp.float32)
    if b_pad != B:
        x_in = jnp.pad(x_in, ((0, b_pad - B), (0, 0)))

    # Advisory cost for XLA's scheduler (tiny latency-bound custom call).
    flops = 2 * b_pad * (state_dim * pw + (NUM_LAYERS - 1) * pw * pw)
    bytes_accessed = (x_in.size * 4            # f32 input read
                      + b_pad * pw * 2         # bf16 output write
                      + w0.size * 2 + w_rest.size * 2   # bf16 weights
                      + b_all.size * 4)        # f32 biases

    out = pl.pallas_call(
        _dqn_kernel,
        out_shape=jax.ShapeDtypeStruct((b_pad, pw), jnp.bfloat16),
        grid=(n_tiles,),
        in_specs=[
            pl.BlockSpec((tb, state_dim), lambda i: (i, 0)),
            # Constant block index every grid step -> weights/biases stay resident
            # in VMEM (no re-DMA across batch tiles).
            pl.BlockSpec((state_dim, pw), lambda i: (0, 0)),
            pl.BlockSpec((NUM_LAYERS - 1, pw, pw), lambda i: (0, 0, 0)),
            pl.BlockSpec((NUM_LAYERS, 1, pw), lambda i: (0, 0, 0)),
        ],
        out_specs=pl.BlockSpec((tb, pw), lambda i: (i, 0)),
        compiler_params=pltpu.CompilerParams(
            dimension_semantics=("parallel",)),
        cost_estimate=pl.CostEstimate(
            flops=flops, transcendentals=0, bytes_accessed=bytes_accessed),
    )(x_in, w0, w_rest, b_all)

    # Slice real rows / action columns; public API stays f32 like the PyTorch module.
    return out[:B, :nb_actions].astype(jnp.float32)


def init_dqn_params(key, state_dim, nb_neurons, nb_actions):
    """Mimics PyTorch's default Linear init: U(-1/sqrt(fan_in), 1/sqrt(fan_in)).
    W is stored transposed vs. PyTorch, i.e. (in_features, out_features)."""
    dims = [state_dim] + [nb_neurons] * 5 + [nb_actions]
    params = []
    for i in range(NUM_LAYERS):
        fan_in, fan_out = dims[i], dims[i + 1]
        key, kw, kb = jax.random.split(key, 3)
        bound = 1.0 / jnp.sqrt(fan_in)
        w = jax.random.uniform(kw, (fan_in, fan_out), jnp.float32, -bound, bound)
        b = jax.random.uniform(kb, (1, fan_out), jnp.float32, -bound, bound)
        params.append((w, b))
    return params


def dqn_reference_f32(x, params):
    """Plain-JAX full-f32 reference (matches the PyTorch module numerics)."""
    h = x
    for i, (w, b) in enumerate(params):
        h = h @ w + b
        if i < len(params) - 1:
            h = jnp.maximum(h, 0.0)
    return h


def dqn_reference_kernel_numerics(x, params):
    """Plain-JAX reference replicating the kernel's numerics: bf16 matmul operands,
    f32 accumulation / bias / ReLU, bf16 inter-layer activations, bf16 output."""
    h = x.astype(jnp.bfloat16)
    y = None
    for i, (w, b) in enumerate(params):
        y = jnp.dot(h, w.astype(jnp.bfloat16),
                    preferred_element_type=jnp.float32) + b
        if i < len(params) - 1:
            h = jnp.maximum(y, 0.0).astype(jnp.bfloat16)
    return y.astype(jnp.bfloat16).astype(jnp.float32)


def _check(out, x, params, nb_actions):
    assert out.shape == (x.shape[0], nb_actions)
    ref_k = dqn_reference_kernel_numerics(x, params)
    assert jnp.allclose(out, ref_k, atol=1e-2, rtol=1e-2), "mismatch vs kernel-numerics reference"
    ref_f32 = dqn_reference_f32(x, params)
    assert jnp.allclose(out, ref_f32, atol=5e-2, rtol=5e-2), "mismatch vs f32 reference"


if __name__ == "__main__":
    key = jax.random.PRNGKey(0)
    key, kx1, kx2 = jax.random.split(key, 3)

    # Small shapes consistent with a DQN: state_dim=32, hidden=64, nb_actions=8.
    state_dim, nb_neurons, nb_actions = 32, 64, 8
    params = init_dqn_params(key, state_dim, nb_neurons, nb_actions)
    w0, w_rest, b_all, _ = pack_dqn_params(params)

    # Case 1: tiny batch (single grid step, single tile).
    x_small = jax.random.normal(kx1, (8, state_dim), jnp.float32)
    out_small = jax.block_until_ready(dqn_forward(x_small, w0, w_rest, b_all, nb_actions))
    _check(out_small, x_small, params, nb_actions)

    # Case 2: larger, non-multiple-of-8 batch -> exercises the 2-tile "parallel"
    # grid (dual-TC path on v7x) and minimal row padding.
    x_big = jax.random.normal(kx2, (1050, state_dim), jnp.float32)
    out_big = jax.block_until_ready(dqn_forward(x_big, w0, w_rest, b_all, nb_actions))
    _check(out_big, x_big, params, nb_actions)

    print("KERNEL_OK")
</pallas_src>

<mosaic_0001>
module attributes {stable_mosaic.version = 11 : i64} {
  func.func @_dqn_kernel(%arg0: i32, %arg1: memref<8x32xf32, #tpu.memory_space<vmem>>, %arg2: memref<32x128xbf16, #tpu.memory_space<vmem>>, %arg3: memref<5x128x128xbf16, #tpu.memory_space<vmem>>, %arg4: memref<6x1x128xf32, #tpu.memory_space<vmem>>, %arg5: memref<8x128xbf16, #tpu.memory_space<vmem>>) attributes {dimension_semantics = [#tpu.dimension_semantics<parallel>], iteration_bounds = array<i64: 1>, scalar_prefetch = 0 : i64, scratch_operands = 0 : i64, tpu.core_type = #tpu.core_type<tc>, window_params = [{transform_indices = @transform_0, window_bounds = array<i64: 8, 32>}, {pipeline_mode = #tpu.pipeline_mode<synchronous>, transform_indices = @transform_1, window_bounds = array<i64: 32, 128>}, {pipeline_mode = #tpu.pipeline_mode<synchronous>, transform_indices = @transform_2, window_bounds = array<i64: 5, 128, 128>}, {pipeline_mode = #tpu.pipeline_mode<synchronous>, transform_indices = @transform_3, window_bounds = array<i64: 6, 1, 128>}, {transform_indices = @transform_4, window_bounds = array<i64: 8, 128>}]} {
    %c0 = arith.constant 0 : index
    %c0_0 = arith.constant 0 : index
    %0 = vector.load %arg1[%c0, %c0_0] : memref<8x32xf32, #tpu.memory_space<vmem>>, vector<8x32xf32>
    %1 = arith.truncf %0 : vector<8x32xf32> to vector<8x32xbf16>
    %c0_1 = arith.constant 0 : index
    %c0_2 = arith.constant 0 : index
    %2 = vector.load %arg2[%c0_1, %c0_2] : memref<32x128xbf16, #tpu.memory_space<vmem>>, vector<32x128xbf16>
    %cst = arith.constant dense<0.000000e+00> : vector<8x128xf32>
    %3 = tpu.matmul %1, %2, %cst {dimension_numbers = #tpu.dot_dimension_numbers<[1], [0], [0], [1], [0, 0, 1, 1], [], []>} : vector<8x32xbf16>, vector<32x128xbf16>, vector<8x128xf32> -> vector<8x128xf32>
    %c0_3 = arith.constant 0 : index
    %c0_4 = arith.constant 0 : index
    %c0_5 = arith.constant 0 : index
    %4 = vector.load %arg4[%c0_3, %c0_4, %c0_5] : memref<6x1x128xf32, #tpu.memory_space<vmem>>, vector<1x1x128xf32>
    %5 = vector.shape_cast %4 : vector<1x1x128xf32> to vector<1x128xf32>
    %6 = vector.broadcast %5 : vector<1x128xf32> to vector<8x128xf32>
    %7 = arith.addf %3, %6 : vector<8x128xf32>
    %cst_6 = arith.constant 0.000000e+00 : f32
    %8 = vector.broadcast %cst_6 : f32 to vector<8x128xf32>
    %9 = arith.maximumf %7, %8 : vector<8x128xf32>
    %10 = arith.truncf %9 : vector<8x128xf32> to vector<8x128xbf16>
    %c0_7 = arith.constant 0 : index
    %c0_8 = arith.constant 0 : index
    %c0_9 = arith.constant 0 : index
    %11 = vector.load %arg3[%c0_7, %c0_8, %c0_9] : memref<5x128x128xbf16, #tpu.memory_space<vmem>>, vector<1x128x128xbf16>
    %12 = vector.shape_cast %11 : vector<1x128x128xbf16> to vector<128x128xbf16>
    %cst_10 = arith.constant dense<0.000000e+00> : vector<8x128xf32>
    %13 = tpu.matmul %10, %12, %cst_10 {dimension_numbers = #tpu.dot_dimension_numbers<[1], [0], [0], [1], [0, 0, 1, 1], [], []>} : vector<8x128xbf16>, vector<128x128xbf16>, vector<8x128xf32> -> vector<8x128xf32>
    %c1 = arith.constant 1 : index
    %c0_11 = arith.constant 0 : index
    %c0_12 = arith.constant 0 : index
    %14 = vector.load %arg4[%c1, %c0_11, %c0_12] : memref<6x1x128xf32, #tpu.memory_space<vmem>>, vector<1x1x128xf32>
    %15 = vector.shape_cast %14 : vector<1x1x128xf32> to vector<1x128xf32>
    %16 = vector.broadcast %15 : vector<1x128xf32> to vector<8x128xf32>
    %17 = arith.addf %13, %16 : vector<8x128xf32>
    %cst_13 = arith.constant 0.000000e+00 : f32
    %18 = vector.broadcast %cst_13 : f32 to vector<8x128xf32>
    %19 = arith.maximumf %17, %18 : vector<8x128xf32>
    %20 = arith.truncf %19 : vector<8x128xf32> to vector<8x128xbf16>
    %c1_14 = arith.constant 1 : index
    %c0_15 = arith.constant 0 : index
    %c0_16 = arith.constant 0 : index
    %21 = vector.load %arg3[%c1_14, %c0_15, %c0_16] : memref<5x128x128xbf16, #tpu.memory_space<vmem>>, vector<1x128x128xbf16>
    %22 = vector.shape_cast %21 : vector<1x128x128xbf16> to vector<128x128xbf16>
    %cst_17 = arith.constant dense<0.000000e+00> : vector<8x128xf32>
    %23 = tpu.matmul %20, %22, %cst_17 {dimension_numbers = #tpu.dot_dimension_numbers<[1], [0], [0], [1], [0, 0, 1, 1], [], []>} : vector<8x128xbf16>, vector<128x128xbf16>, vector<8x128xf32> -> vector<8x128xf32>
    %c2 = arith.constant 2 : index
    %c0_18 = arith.constant 0 : index
    %c0_19 = arith.constant 0 : index
    %24 = vector.load %arg4[%c2, %c0_18, %c0_19] : memref<6x1x128xf32, #tpu.memory_space<vmem>>, vector<1x1x128xf32>
    %25 = vector.shape_cast %24 : vector<1x1x128xf32> to vector<1x128xf32>
    %26 = vector.broadcast %25 : vector<1x128xf32> to vector<8x128xf32>
    %27 = arith.addf %23, %26 : vector<8x128xf32>
    %cst_20 = arith.constant 0.000000e+00 : f32
    %28 = vector.broadcast %cst_20 : f32 to vector<8x128xf32>
    %29 = arith.maximumf %27, %28 : vector<8x128xf32>
    %30 = arith.truncf %29 : vector<8x128xf32> to vector<8x128xbf16>
    %c2_21 = arith.constant 2 : index
    %c0_22 = arith.constant 0 : index
    %c0_23 = arith.constant 0 : index
    %31 = vector.load %arg3[%c2_21, %c0_22, %c0_23] : memref<5x128x128xbf16, #tpu.memory_space<vmem>>, vector<1x128x128xbf16>
    %32 = vector.shape_cast %31 : vector<1x128x128xbf16> to vector<128x128xbf16>
    %cst_24 = arith.constant dense<0.000000e+00> : vector<8x128xf32>
    %33 = tpu.matmul %30, %32, %cst_24 {dimension_numbers = #tpu.dot_dimension_numbers<[1], [0], [0], [1], [0, 0, 1, 1], [], []>} : vector<8x128xbf16>, vector<128x128xbf16>, vector<8x128xf32> -> vector<8x128xf32>
    %c3 = arith.constant 3 : index
    %c0_25 = arith.constant 0 : index
    %c0_26 = arith.constant 0 : index
    %34 = vector.load %arg4[%c3, %c0_25, %c0_26] : memref<6x1x128xf32, #tpu.memory_space<vmem>>, vector<1x1x128xf32>
    %35 = vector.shape_cast %34 : vector<1x1x128xf32> to vector<1x128xf32>
    %36 = vector.broadcast %35 : vector<1x128xf32> to vector<8x128xf32>
    %37 = arith.addf %33, %36 : vector<8x128xf32>
    %cst_27 = arith.constant 0.000000e+00 : f32
    %38 = vector.broadcast %cst_27 : f32 to vector<8x128xf32>
    %39 = arith.maximumf %37, %38 : vector<8x128xf32>
    %40 = arith.truncf %39 : vector<8x128xf32> to vector<8x128xbf16>
    %c3_28 = arith.constant 3 : index
    %c0_29 = arith.constant 0 : index
    %c0_30 = arith.constant 0 : index
    %41 = vector.load %arg3[%c3_28, %c0_29, %c0_30] : memref<5x128x128xbf16, #tpu.memory_space<vmem>>, vector<1x128x128xbf16>
    %42 = vector.shape_cast %41 : vector<1x128x128xbf16> to vector<128x128xbf16>
    %cst_31 = arith.constant dense<0.000000e+00> : vector<8x128xf32>
    %43 = tpu.matmul %40, %42, %cst_31 {dimension_numbers = #tpu.dot_dimension_numbers<[1], [0], [0], [1], [0, 0, 1, 1], [], []>} : vector<8x128xbf16>, vector<128x128xbf16>, vector<8x128xf32> -> vector<8x128xf32>
    %c4 = arith.constant 4 : index
    %c0_32 = arith.constant 0 : index
    %c0_33 = arith.constant 0 : index
    %44 = vector.load %arg4[%c4, %c0_32, %c0_33] : memref<6x1x128xf32, #tpu.memory_space<vmem>>, vector<1x1x128xf32>
    %45 = vector.shape_cast %44 : vector<1x1x128xf32> to vector<1x128xf32>
    %46 = vector.broadcast %45 : vector<1x128xf32> to vector<8x128xf32>
    %47 = arith.addf %43, %46 : vector<8x128xf32>
    %cst_34 = arith.constant 0.000000e+00 : f32
    %48 = vector.broadcast %cst_34 : f32 to vector<8x128xf32>
    %49 = arith.maximumf %47, %48 : vector<8x128xf32>
    %50 = arith.truncf %49 : vector<8x128xf32> to vector<8x128xbf16>
    %c4_35 = arith.constant 4 : index
    %c0_36 = arith.constant 0 : index
    %c0_37 = arith.constant 0 : index
    %51 = vector.load %arg3[%c4_35, %c0_36, %c0_37] : memref<5x128x128xbf16, #tpu.memory_space<vmem>>, vector<1x128x128xbf16>
    %52 = vector.shape_cast %51 : vector<1x128x128xbf16> to vector<128x128xbf16>
    %cst_38 = arith.constant dense<0.000000e+00> : vector<8x128xf32>
    %53 = tpu.matmul %50, %52, %cst_38 {dimension_numbers = #tpu.dot_dimension_numbers<[1], [0], [0], [1], [0, 0, 1, 1], [], []>} : vector<8x128xbf16>, vector<128x128xbf16>, vector<8x128xf32> -> vector<8x128xf32>
    %c5 = arith.constant 5 : index
    %c0_39 = arith.constant 0 : index
    %c0_40 = arith.constant 0 : index
    %54 = vector.load %arg4[%c5, %c0_39, %c0_40] : memref<6x1x128xf32, #tpu.memory_space<vmem>>, vector<1x1x128xf32>
    %55 = vector.shape_cast %54 : vector<1x1x128xf32> to vector<1x128xf32>
    %56 = vector.broadcast %55 : vector<1x128xf32> to vector<8x128xf32>
    %57 = arith.addf %53, %56 : vector<8x128xf32>
    %58 = arith.truncf %57 : vector<8x128xf32> to vector<8x128xbf16>
    %c0_41 = arith.constant 0 : index
    %c0_42 = arith.constant 0 : index
    %59 = vector.load %arg5[%c0_41, %c0_42] : memref<8x128xbf16, #tpu.memory_space<vmem>>, vector<8x128xbf16>
    tpu.vector_store %arg5[%c0_41, %c0_42], %58 {strides = array<i32>} : memref<8x128xbf16, #tpu.memory_space<vmem>>, vector<8x128xbf16>,
    return
  }
  func.func @transform_0(%arg0: i32) -> (i32, i32) {
    %c0_i32 = arith.constant 0 : i32
    %c0_i32_0 = arith.constant 0 : i32
    return %arg0, %c0_i32 : i32, i32
  }
  func.func @transform_1(%arg0: i32) -> (i32, i32) {
    %c0_i32 = arith.constant 0 : i32
    %c0_i32_0 = arith.constant 0 : i32
    %c0_i32_1 = arith.constant 0 : i32
    return %c0_i32, %c0_i32_0 : i32, i32
  }
  func.func @transform_2(%arg0: i32) -> (i32, i32, i32) {
    %c0_i32 = arith.constant 0 : i32
    %c0_i32_0 = arith.constant 0 : i32
    %c0_i32_1 = arith.constant 0 : i32
    %c0_i32_2 = arith.constant 0 : i32
    return %c0_i32, %c0_i32_0, %c0_i32_1 : i32, i32, i32
  }
  func.func @transform_3(%arg0: i32) -> (i32, i32, i32) {
    %c0_i32 = arith.constant 0 : i32
    %c0_i32_0 = arith.constant 0 : i32
    %c0_i32_1 = arith.constant 0 : i32
    %c0_i32_2 = arith.constant 0 : i32
    return %c0_i32, %c0_i32_0, %c0_i32_1 : i32, i32, i32
  }
  func.func @transform_4(%arg0: i32) -> (i32, i32) {
    %c0_i32 = arith.constant 0 : i32
    %c0_i32_0 = arith.constant 0 : i32
    return %arg0, %c0_i32 : i32, i32
  }
}

</mosaic_0001>

<bundles_post_ra>
// kernel: tpu_custom_call.1
= control target key start
LH: loop header
LB: loop body
LE: loop exit
PB: predicated region body
PF: predicated region fallthrough
CT: control target
= control target key end

     0   :  { %9 = vsyncpa [#allocation3], 0  ;;  %s1232_s0 = inlined_call_operand.hbm [shape: f32[8,32], index: 0, kind: input, shape index: {}]   ;;  %s1233_s1 = inlined_call_operand.hbm [shape: bf16[32,128], index: 1, kind: input, shape index: {}]   ;;  %s1234_s2 = inlined_call_operand.hbm [shape: bf16[5,128,128], index: 2, kind: input, shape index: {}]   ;;  %s1235_s3 = inlined_call_operand.vmem [shape: f32[6,1,128], index: 3, kind: input, shape index: {}]   ;;  %s1236_s4 = inlined_call_operand.hbm [shape: bf16[8,128], index: 4, kind: output, shape index: {}]  }
   0x1   :  { %10 = vsyncpa [#allocation6], 0 }
   0x2   :  { %11 = vsyncpa [#allocation4], 0  ;;  %s1073_s15 = smov [#allocation5]   ;;  %s979_s19 = scalar_lea.hbm %s1233_s1, 256 }
   0x3   :  { %s27_s16 = sshll.u32 %s1073_s15, 4  ;;  %p980_p0 = scmp.ne.s32.totalorder %s1233_s1, %s979_s19  ;;  %s28_s16 = int_to_ptr.vmem [resolvable:$true] %s27_s16 }
   0x4   :  { %p983_p1 = scmp.lt.u32.totalorder %s979_s19, %s1233_s1 }
   0x6   :  { %p985_p2 = pnand %p983_p1, %p980_p0 }
   0x8   :  { %988 = shalt.err (!%p985_p2)
}
   0x9   :  { %s989_s24 = scalar_lea.vmem %s28_s16, 256  ;;  %p994_p4 = scmp.lt.s32.totalorder %s28_s16, %s28_s16 }
   0xa   :  { %p990_p3 = scmp.ne.s32.totalorder %s28_s16, %s989_s24  ;;  %p995_p5 = scmp.lt.s32.totalorder %s989_s24, %s989_s24 }
   0xc   :  { %p996_p6 = por %p995_p5, %p994_p4 }
   0xe   :  { %p997_p7 = pnand %p996_p6, %p990_p3 }
  0x10   :  { %1000 = shalt.err (!%p997_p7)
}
  0x11   :  { %s1074_s25 = smov 64   ;;  %s1075_s26 = smov 4  }
  0x12   :  { %33 = dma.hbm_to_vmem [thread:$0]  %s1233_s1, 256, %s28_s16, [#allocation6], %s1074_s25, %s1074_s25, %s1075_s26  }
  0x13   :  { %s1076_s29 = smov [#allocation2]   ;;  %s1077_s5 = smov [#allocation7]  }
  0x14   :  { %s18_s30 = sshll.u32 %s1076_s29, 4  ;;  %s39_s6 = sshll.u32 %s1077_s5, 4  ;;  %s19_s30 = int_to_ptr.vmem [resolvable:$true] %s18_s30  ;;  %s40_s6 = int_to_ptr.vmem [resolvable:$true] %s39_s6 }
  0x15   :  { %s1001_s9 = scalar_lea.hbm %s1232_s0, 128 }
  0x16   :  { %p1002_p8 = scmp.ne.s32.totalorder %s1232_s0, %s1001_s9  ;;  %p1005_p9 = scmp.lt.u32.totalorder %s1001_s9, %s1232_s0 }
  0x18   :  { %p1007_p10 = pnand %p1005_p9, %p1002_p8 }
  0x1a   :  { %1010 = shalt.err (!%p1007_p10)
}
  0x1b   :  { %s1011_s1 = scalar_lea.vmem %s19_s30, 128  ;;  %p1016_p12 = scmp.lt.s32.totalorder %s19_s30, %s19_s30 }
  0x1c   :  { %p1012_p11 = scmp.ne.s32.totalorder %s19_s30, %s1011_s1  ;;  %p1017_p13 = scmp.lt.s32.totalorder %s1011_s1, %s1011_s1 }
  0x1e   :  { %p1018_p0 = por %p1017_p13, %p1016_p12 }
  0x20   :  { %p1019_p1 = pnand %p1018_p0, %p1012_p11 }
  0x22   :  { %1022 = shalt.err (!%p1019_p1)
}
  0x23   :  { %21 = dma.hbm_to_vmem [thread:$0]  %s1232_s0, 128, %s19_s30, [#allocation3]  }
  0x24   :  { %s1023_s18 = scalar_lea.hbm %s1234_s2, 5120 }
  0x25   :  { %p1024_p2 = scmp.ne.s32.totalorder %s1234_s2, %s1023_s18  ;;  %p1027_p3 = scmp.lt.u32.totalorder %s1023_s18, %s1234_s2 }
  0x27   :  { %p1029_p4 = pnand %p1027_p3, %p1024_p2 }
  0x29   :  { %1032 = shalt.err (!%p1029_p4)
}
  0x2a   :  { %s1033_s23 = scalar_lea.vmem %s40_s6, 5120  ;;  %p1038_p6 = scmp.lt.s32.totalorder %s40_s6, %s40_s6 }
  0x2b   :  { %p1034_p5 = scmp.ne.s32.totalorder %s40_s6, %s1033_s23  ;;  %p1039_p7 = scmp.lt.s32.totalorder %s1033_s23, %s1033_s23 }
  0x2d   :  { %p1040_p8 = por %p1039_p7, %p1038_p6 }
  0x2f   :  { %p1041_p9 = pnand %p1040_p8, %p1034_p5 }
  0x31   :  { %1044 = shalt.err (!%p1041_p9)
}
  0x32   :  { %45 = dma.hbm_to_vmem [thread:$0]  %s1234_s2, 5120, %s40_s6, [#allocation6], %s1074_s25, %s1074_s25, %s1075_s26  }
  0x33   :  { %1067 = dma.done.wait [#allocation3], 128  }
  0x34   :  { %1068 = vsyncadd [#allocation3], 4294967168 }
  0x35   :  { %1069 = dma.done.wait [#allocation6], 5376  }
  0x36   :  { %1070 = vsyncadd [#allocation6], 4294961920  ;;  %v1078_v0 = vmov 0.0   ;;  %vm1079_vm0 = vmmov 0   ;;  %v937_v1 = vld [vmem:[#allocation5] sm:$0xff]   ;;  %v938_v2 = vld [vmem:[#allocation5 + $0x8] sm:$0xff]  }
  0x37   :  { %821 = vmatprep.subr.bf16.mxu0 %v1078_v0  ;;  %825 = vmatprep.mubr.msk.bf16.mxu0 %vm1079_vm0, %v1078_v0  ;;  %v58_v3 = vld [vmem:[#allocation2] sm:$0xff]  ;;  %v939_v4 = vld [vmem:[#allocation7] sm:$0xff]   ;;  %vm83_vm1 = vcmask 261120   ;;  %v941_v7 = vld [vmem:[#allocation7 + $0x10] sm:$0xff]   ;;  %s1080_s10 = smov [#allocation8]  }
  0x38   :  { %829 = vmatprep.subr.bf16.mxu1 %v1078_v0  ;;  %845 = vmatprep.mubr.msk.bf16.mxu1 %vm1079_vm0, %v1078_v0  ;;  %v59_v5 = vpack.c.bf16 %v58_v3, %v58_v3  ;;  %v940_v6 = vld [vmem:[#allocation7 + $0x8] sm:$0xff]   ;;  %v942_v8 = vld [vmem:[#allocation7 + $0x18] sm:$0xff]   ;;  %v943_v9 = vld [vmem:[#allocation7 + $0x20] sm:$0xff]   ;;  %s709_s11 = sshll.u32 %s1080_s10, 4  ;;  %s710_s11 = int_to_ptr.vmem [resolvable:$true] %s709_s11 }
  0x39   :  { %822 = vmatpush3.bf16.msra.mxu0 %v937_v1  ;;  %830 = vmatpush3.bf16.msra.mxu1 %v939_v4  ;;  %v944_v10 = vld [vmem:[#allocation7 + $0x28] sm:$0xff]   ;;  %v945_v11 = vld [vmem:[#allocation7 + $0x30] sm:$0xff]   ;;  %v946_v12 = vld [vmem:[#allocation7 + $0x38] sm:$0xff]   ;;  %s1045_s12 = scalar_lea.vmem %s710_s11, 64  ;;  %p1050_p11 = scmp.lt.s32.totalorder %s710_s11, %s710_s11 }
  0x3a   :  { %823 = vmatprep.subr.bf16.mxu0 %v1078_v0  ;;  %831 = vmatprep.subr.bf16.mxu1 %v1078_v0  ;;  %v947_v13 = vld [vmem:[#allocation7 + $0x40] sm:$0xff]   ;;  %v948_v14 = vld [vmem:[#allocation7 + $0x48] sm:$0xff]   ;;  %v949_v15 = vld [vmem:[#allocation7 + $0x50] sm:$0xff]   ;;  %p1046_p10 = scmp.ne.s32.totalorder %s710_s11, %s1045_s12  ;;  %p1051_p12 = scmp.lt.s32.totalorder %s1045_s12, %s1045_s12 }
  0x3b   :  { %v950_v16 = vld [vmem:[#allocation7 + $0x58] sm:$0xff]   ;;  %v951_v17 = vld [vmem:[#allocation7 + $0x60] sm:$0xff]   ;;  %v952_v18 = vld [vmem:[#allocation7 + $0x68] sm:$0xff]  }
  0x3c   :  { %v719_v19 = vld [vmem:[%s1235_s3] ss:$0 sm:$0xff]  ;;  %v953_v27 = vld [vmem:[#allocation7 + $0x70] sm:$0xff]   ;;  %v954_v28 = vld [vmem:[#allocation7 + $0x78] sm:$0xff]   ;;  %p1052_p13 = por %p1051_p12, %p1050_p11 }
  0x3d   :  { %824 = vmatpush3.bf16.msra.mxu0 %v938_v2  ;;  %832 = vmatpush3.bf16.msra.mxu1 %v940_v6  ;;  %v955_v29 = vld [vmem:[#allocation7 + $0x80] sm:$0xff]   ;;  %v956_v30 = vld [vmem:[#allocation7 + $0x88] sm:$0xff]   ;;  %v957_v31 = vld [vmem:[#allocation7 + $0x90] sm:$0xff]  }
  0x3e   :  { %849 = vmatprep.subr.bf16.mxu0 %v1078_v0  ;;  %833 = vmatprep.subr.bf16.mxu1 %v1078_v0  ;;  %v958_v32 = vld [vmem:[#allocation7 + $0x98] sm:$0xff]   ;;  %v959_v33 = vld [vmem:[#allocation7 + $0xa0] sm:$0xff]   ;;  %v960_v34 = vld [vmem:[#allocation7 + $0xa8] sm:$0xff]   ;;  %p1053_p0 = pnand %p1052_p13, %p1046_p10 }
  0x3f   :  { %v724_v35 = vld [vmem:[%s1235_s3 + $0x1] ss:$0 sm:$0xff]  ;;  %v961_v43 = vld [vmem:[#allocation7 + $0xb0] sm:$0xff]   ;;  %v962_v44 = vld [vmem:[#allocation7 + $0xb8] sm:$0xff]  }
  0x40   :  { %826 = vmatmul.mubr.msk.bf16.vlgmr.msra.gmra.mrb[0].mxu0 %vm83_vm1, %v59_v5  ;;  %v963_v45 = vld [vmem:[#allocation7 + $0xc0] sm:$0xff]   ;;  %v964_v46 = vld [vmem:[#allocation7 + $0xc8] sm:$0xff]   ;;  %v965_v47 = vld [vmem:[#allocation7 + $0xd0] sm:$0xff]  }
  0x41   :  { %865 = vmatprep.mubr.msk.bf16.mxu0 %vm1079_vm0, %v1078_v0  ;;  %834 = vmatpush3.bf16.msra.mxu1 %v941_v7  ;;  %v966_v48 = vld [vmem:[#allocation7 + $0xd8] sm:$0xff]   ;;  %v967_v49 = vld [vmem:[#allocation7 + $0xe0] sm:$0xff]   ;;  %v968_v50 = vld [vmem:[#allocation7 + $0xe8] sm:$0xff]  }
  0x42   :  { %835 = vmatprep.subr.bf16.mxu1 %v1078_v0  ;;  %850 = vmatpush3.bf16.msra.mxu0 %v947_v13  ;;  %v734_v51 = vld [vmem:[%s1235_s3 + $0x2] ss:$0 sm:$0xff]  ;;  %v969_v59 = vld [vmem:[#allocation7 + $0xf0] sm:$0xff]   ;;  %v970_v60 = vld [vmem:[#allocation7 + $0xf8] sm:$0xff]  }
  0x43   :  { %851 = vmatprep.subr.bf16.mxu0 %v1078_v0  ;;  %v971_v61 = vld [vmem:[#allocation7 + $0x100] sm:$0xff]   ;;  %v972_v62 = vld [vmem:[#allocation7 + $0x108] sm:$0xff]   ;;  %v973_v63 = vld [vmem:[#allocation7 + $0x110] sm:$0xff]  }
  0x44   :  { %v974_v1 = vld [vmem:[#allocation7 + $0x118] sm:$0xff]   ;;  %v975_v2 = vld [vmem:[#allocation7 + $0x120] sm:$0xff]   ;;  %v976_v3 = vld [vmem:[#allocation7 + $0x128] sm:$0xff]  }
  0x45   :  { %836 = vmatpush3.bf16.msra.mxu1 %v942_v8  ;;  %v744_v4 = vld [vmem:[%s1235_s3 + $0x3] ss:$0 sm:$0xff]  ;;  %v978_v13 = vld [vmem:[#allocation7 + $0x138] sm:$0xff]  }
  0x46   :  { %837 = vmatprep.subr.bf16.mxu1 %v1078_v0  ;;  %852 = vmatpush3.bf16.msra.mxu0 %v948_v14  ;;  %v754_v14 = vld [vmem:[%s1235_s3 + $0x4] ss:$0 sm:$0xff] }
  0x47   :  { %853 = vmatprep.subr.bf16.mxu0 %v1078_v0 }
  0x49   :  { %838 = vmatpush3.bf16.msra.mxu1 %v943_v9 }
  0x4a   :  { %839 = vmatprep.subr.bf16.mxu1 %v1078_v0  ;;  %854 = vmatpush3.bf16.msra.mxu0 %v949_v15 }
  0x4b   :  { %855 = vmatprep.subr.bf16.mxu0 %v1078_v0 }
  0x4d   :  { %840 = vmatpush3.bf16.msra.mxu1 %v944_v10 }
  0x4e   :  { %841 = vmatprep.subr.bf16.mxu1 %v1078_v0  ;;  %856 = vmatpush3.bf16.msra.mxu0 %v950_v16 }
  0x4f   :  { %857 = vmatprep.subr.bf16.mxu0 %v1078_v0 }
  0x51   :  { %842 = vmatpush3.bf16.msra.mxu1 %v945_v11 }
  0x52   :  { %843 = vmatprep.subr.bf16.mxu1 %v1078_v0  ;;  %858 = vmatpush3.bf16.msra.mxu0 %v951_v17 }
  0x53   :  { %859 = vmatprep.subr.bf16.mxu0 %v1078_v0 }
  0x55   :  { %844 = vmatpush3.bf16.msra.mxu1 %v946_v12  ;;  %v977_v12 = vld [vmem:[#allocation7 + $0x130] sm:$0xff]  }
  0x56   :  { %869 = vmatprep.subr.bf16.mxu1 %v1078_v0  ;;  %860 = vmatpush3.bf16.msra.mxu0 %v952_v18 }
  0x57   :  { %861 = vmatprep.subr.bf16.mxu0 %v1078_v0 }
  0x5a   :  { %862 = vmatpush3.bf16.msra.mxu0 %v953_v27 }
  0x5b   :  { %863 = vmatprep.subr.bf16.mxu0 %v1078_v0 }
  0x5e   :  { %864 = vmatpush3.bf16.msra.mxu0 %v954_v28 }
  0x5f   :  { %889 = vmatprep.subr.bf16.mxu0 %v1078_v0 }
 0x113   :  { %v121_v20 = vpop.f32.mrb[0].mxu0 }
 0x114   :  { %v122_v21 = vadd.f32 %v719_v19, %v121_v20  ;;  %v827_v22 = vpop.f32.mrb[1].mxu0 }
 0x115   :  { %v124_v23 = vpop.f32.mrb[2].mxu0  ;;  %v764_v22 = vld [vmem:[%s1235_s3 + $0x5] ss:$0 sm:$0xff] }
 0x116   :  { %v127_v24 = vmax.f32 %v122_v21, 0.0  ;;  %v828_v25 = vpop.f32.mrb[3].mxu0 }
 0x118   :  { %v128_v26 = vpack.c.bf16 %v127_v24, %v127_v24 }
 0x11a   :  { %846 = vmatmul.mubr.bf16.vlgmr.msra.gmra.mrb[0].mxu1 %v128_v26 }
 0x11b   :  { %885 = vmatprep.mubr.msk.bf16.mxu1 %vm1079_vm0, %v1078_v0  ;;  %870 = vmatpush3.bf16.msra.mxu1 %v955_v29 }
 0x11c   :  { %871 = vmatprep.subr.bf16.mxu1 %v1078_v0 }
 0x11f   :  { %872 = vmatpush3.bf16.msra.mxu1 %v956_v30 }
 0x120   :  { %873 = vmatprep.subr.bf16.mxu1 %v1078_v0 }
 0x123   :  { %874 = vmatpush3.bf16.msra.mxu1 %v957_v31 }
 0x124   :  { %875 = vmatprep.subr.bf16.mxu1 %v1078_v0 }
 0x127   :  { %876 = vmatpush3.bf16.msra.mxu1 %v958_v32 }
 0x128   :  { %877 = vmatprep.subr.bf16.mxu1 %v1078_v0 }
 0x12b   :  { %878 = vmatpush3.bf16.msra.mxu1 %v959_v33 }
 0x12c   :  { %879 = vmatprep.subr.bf16.mxu1 %v1078_v0 }
 0x12f   :  { %880 = vmatpush3.bf16.msra.mxu1 %v960_v34 }
 0x130   :  { %881 = vmatprep.subr.bf16.mxu1 %v1078_v0 }
 0x133   :  { %882 = vmatpush3.bf16.msra.mxu1 %v961_v43 }
 0x134   :  { %883 = vmatprep.subr.bf16.mxu1 %v1078_v0 }
 0x137   :  { %884 = vmatpush3.bf16.msra.mxu1 %v962_v44 }
 0x138   :  { %909 = vmatprep.subr.bf16.mxu1 %v1078_v0 }
 0x1ed   :  { %v235_v36 = vpop.f32.mrb[0].mxu1 }
 0x1ee   :  { %v236_v37 = vadd.f32 %v724_v35, %v235_v36  ;;  %v847_v38 = vpop.f32.mrb[1].mxu1 }
 0x1ef   :  { %v238_v39 = vpop.f32.mrb[2].mxu1 }
 0x1f0   :  { %v241_v40 = vmax.f32 %v236_v37, 0.0  ;;  %v848_v41 = vpop.f32.mrb[3].mxu1 }
 0x1f2   :  { %v242_v42 = vpack.c.bf16 %v241_v40, %v241_v40 }
 0x1f4   :  { %866 = vmatmul.mubr.bf16.vlgmr.msra.gmra.mrb[4].mxu0 %v242_v42 }
 0x1f5   :  { %905 = vmatprep.mubr.msk.bf16.mxu0 %vm1079_vm0, %v1078_v0  ;;  %890 = vmatpush3.bf16.msra.mxu0 %v963_v45 }
 0x1f6   :  { %891 = vmatprep.subr.bf16.mxu0 %v1078_v0 }
 0x1f9   :  { %892 = vmatpush3.bf16.msra.mxu0 %v964_v46 }
 0x1fa   :  { %893 = vmatprep.subr.bf16.mxu0 %v1078_v0 }
 0x1fd   :  { %894 = vmatpush3.bf16.msra.mxu0 %v965_v47 }
 0x1fe   :  { %895 = vmatprep.subr.bf16.mxu0 %v1078_v0 }
 0x201   :  { %896 = vmatpush3.bf16.msra.mxu0 %v966_v48 }
 0x202   :  { %897 = vmatprep.subr.bf16.mxu0 %v1078_v0 }
 0x205   :  { %898 = vmatpush3.bf16.msra.mxu0 %v967_v49 }
 0x206   :  { %899 = vmatprep.subr.bf16.mxu0 %v1078_v0 }
 0x209   :  { %900 = vmatpush3.bf16.msra.mxu0 %v968_v50 }
 0x20a   :  { %901 = vmatprep.subr.bf16.mxu0 %v1078_v0 }
 0x20d   :  { %902 = vmatpush3.bf16.msra.mxu0 %v969_v59 }
 0x20e   :  { %903 = vmatprep.subr.bf16.mxu0 %v1078_v0 }
 0x211   :  { %904 = vmatpush3.bf16.msra.mxu0 %v970_v60 }
 0x2c7   :  { %v350_v52 = vpop.f32.mrb[4].mxu0 }
 0x2c8   :  { %v351_v53 = vadd.f32 %v734_v51, %v350_v52  ;;  %v867_v54 = vpop.f32.mrb[5].mxu0 }
 0x2c9   :  { %v353_v55 = vpop.f32.mrb[6].mxu0 }
 0x2ca   :  { %v356_v56 = vmax.f32 %v351_v53, 0.0  ;;  %v868_v57 = vpop.f32.mrb[7].mxu0 }
 0x2cc   :  { %v357_v58 = vpack.c.bf16 %v356_v56, %v356_v56 }
 0x2ce   :  { %886 = vmatmul.mubr.bf16.vlgmr.msra.gmra.mrb[4].mxu1 %v357_v58 }
 0x2cf   :  { %925 = vmatprep.mubr.msk.bf16.mxu1 %vm1079_vm0, %v1078_v0  ;;  %910 = vmatpush3.bf16.msra.mxu1 %v971_v61 }
 0x2d0   :  { %911 = vmatprep.subr.bf16.mxu1 %v1078_v0 }
 0x2d3   :  { %912 = vmatpush3.bf16.msra.mxu1 %v972_v62 }
 0x2d4   :  { %913 = vmatprep.subr.bf16.mxu1 %v1078_v0 }
 0x2d7   :  { %914 = vmatpush3.bf16.msra.mxu1 %v973_v63 }
 0x2d8   :  { %915 = vmatprep.subr.bf16.mxu1 %v1078_v0 }
 0x2db   :  { %916 = vmatpush3.bf16.msra.mxu1 %v974_v1 }
 0x2dc   :  { %917 = vmatprep.subr.bf16.mxu1 %v1078_v0 }
 0x2df   :  { %918 = vmatpush3.bf16.msra.mxu1 %v975_v2 }
 0x2e0   :  { %919 = vmatprep.subr.bf16.mxu1 %v1078_v0 }
 0x2e3   :  { %920 = vmatpush3.bf16.msra.mxu1 %v976_v3 }
 0x2e4   :  { %921 = vmatprep.subr.bf16.mxu1 %v1078_v0 }
 0x2e7   :  { %922 = vmatpush3.bf16.msra.mxu1 %v977_v12 }
 0x2e8   :  { %923 = vmatprep.subr.bf16.mxu1 %v1078_v0 }
 0x2eb   :  { %924 = vmatpush3.bf16.msra.mxu1 %v978_v13 }
 0x3a1   :  { %v465_v5 = vpop.f32.mrb[4].mxu1 }
 0x3a2   :  { %v466_v6 = vadd.f32 %v744_v4, %v465_v5  ;;  %v887_v7 = vpop.f32.mrb[5].mxu1 }
 0x3a3   :  { %v468_v8 = vpop.f32.mrb[6].mxu1 }
 0x3a4   :  { %v471_v9 = vmax.f32 %v466_v6, 0.0  ;;  %v888_v10 = vpop.f32.mrb[7].mxu1 }
 0x3a6   :  { %v472_v11 = vpack.c.bf16 %v471_v9, %v471_v9 }
 0x3a8   :  { %906 = vmatmul.mubr.bf16.vlgmr.msra.gmra.mrb[8].mxu0 %v472_v11 }
 0x47b   :  { %v580_v15 = vpop.f32.mrb[8].mxu0 }
 0x47c   :  { %v581_v16 = vadd.f32 %v754_v14, %v580_v15  ;;  %v907_v17 = vpop.f32.mrb[9].mxu0 }
 0x47d   :  { %v583_v18 = vpop.f32.mrb[10].mxu0 }
 0x47e   :  { %v586_v19 = vmax.f32 %v581_v16, 0.0  ;;  %v908_v20 = vpop.f32.mrb[11].mxu0 }
 0x480   :  { %v587_v21 = vpack.c.bf16 %v586_v19, %v586_v19 }
 0x482   :  { %926 = vmatmul.mubr.bf16.vlgmr.msra.gmra.mrb[8].mxu1 %v587_v21 }
 0x555   :  { %v695_v23 = vpop.f32.mrb[8].mxu1 }
 0x556   :  { %v696_v0 = vadd.f32 %v764_v22, %v695_v23  ;;  %v927_v24 = vpop.f32.mrb[9].mxu1 }
 0x557   :  { %v698_v25 = vpop.f32.mrb[10].mxu1 }
 0x558   :  { %v701_v26 = vpack.c.bf16 %v696_v0, %v696_v0  ;;  %v928_v27 = vpop.f32.mrb[11].mxu1 }
 0x55a   :  { %702 = vst [vmem:[#allocation8] sm:$0xf] %v701_v26 }
 0x55b   :  { %1056 = shalt.err (!%p1053_p0)
}
 0x55c   :  { %s1057_s3 = scalar_lea.hbm %s1236_s4, 64 }
 0x55d   :  { %p1058_p1 = scmp.ne.s32.totalorder %s1236_s4, %s1057_s3  ;;  %p1061_p2 = scmp.lt.u32.totalorder %s1057_s3, %s1236_s4 }
 0x55f   :  { %p1063_p3 = pnand %p1061_p2, %p1058_p1 }
 0x561   :  { %1066 = shalt.err (!%p1063_p3)
}
 0x562   :  { %712 = dma.vmem_to_hbm [thread:$0]  %s710_s11, 64, %s1236_s4, [#allocation4]  }
 0x563   :  { %1071 = dma.done.wait [#allocation4], 64  }
 0x564   :  { %1072 = vsyncadd [#allocation4], 4294967232 }
 0x565   :  { %716 = vsyncpa [#allocation3], 1 }
 0x566   :  { %717 = vsyncpa [#allocation6], 1 }
 0x567   :  { %718 = vsyncpa [#allocation4], 1 }

</bundles_post_ra>
